<compile_context>
chip_gen: v7x
topology: tpu7x:2x2x1
jax: 0.10.0
libtpu: 0.0.40
codegen_flags: <defaults>
</compile_context>

<pallas_src>
import jax
import jax.numpy as jnp
from jax.experimental import pallas as pl
from jax.experimental.pallas import tpu as pltpu


def _round_up(n, m):
    return (n + m - 1) // m * m


def _tpu_generation_info():
    """(tensorcores_per_chip, safe_vmem_limit_cap_bytes) for the local TPU."""
    try:
        kind = jax.devices()[0].device_kind.lower()
    except Exception:
        kind = ""
    if "v7" in kind:
        # v7x: 2 TensorCores/chip, only 64 MiB physical VMEM/TC -> leave headroom.
        return 2, 48 << 20
    # v5e / v6e: 1 TensorCore, 128 MiB physical VMEM.
    return 1, 100 << 20


def _pick_batch_tile(B, n_cores):
    """Rows per grid step.

    Big tiles amortize the ~0.35us per-step overhead and MXU fill (K/N are
    tiny, so M is the only useful axis); at ~3 KiB/row of VMEM an 8192-row
    tile is still comfortable.  On v7x (2 TCs sharing the parallel grid axis)
    keep the grid an even multiple so both cores get equal work.
    """
    max_tile = 8192
    if n_cores > 1 and B >= n_cores * 1024:
        m = pl.cdiv(B, n_cores * max_tile)
        return _round_up(pl.cdiv(B, n_cores * m), 16)
    if B > max_tile:
        m = pl.cdiv(B, max_tile)
        return _round_up(pl.cdiv(B, m), 16)
    if B <= 16:
        return B                      # single block == full array, always legal
    return _round_up(B, 16)           # 16-row aligned for bf16 (16,128) packing


def _ae_kernel(x_ref,
               w1_ref, b1_ref,
               w2_ref, b2_ref,
               w3_ref, b3_ref,
               w4_ref, b4_ref,
               out_ref):
    """Full autoencoder forward for one batch tile.

    x / weights arrive in f32 and are cast to bf16 on the VPU; matmuls
    accumulate in f32 on the MXU; bias-add/ReLU stay in f32; Dropout = id.
    """
    cd = jnp.bfloat16
    x = x_ref[...].astype(cd)

    # encoder layer 1: (TB, D) @ (D, H) + (1, H), ReLU
    h = jnp.dot(x, w1_ref[...].astype(cd),
                preferred_element_type=jnp.float32) + b1_ref[...]
    h = jnp.maximum(h, 0.0).astype(cd)

    # encoder layer 2: (TB, H) @ (H, L) + (1, L), ReLU  -> latent
    z = jnp.dot(h, w2_ref[...].astype(cd),
                preferred_element_type=jnp.float32) + b2_ref[...]
    z = jnp.maximum(z, 0.0).astype(cd)

    # decoder layer 1: (TB, L) @ (L, H) + (1, H), ReLU
    d = jnp.dot(z, w3_ref[...].astype(cd),
                preferred_element_type=jnp.float32) + b3_ref[...]
    d = jnp.maximum(d, 0.0).astype(cd)

    # decoder layer 2: (TB, H) @ (H, D) + (1, D)   (no activation)
    out = jnp.dot(d, w4_ref[...].astype(cd),
                  preferred_element_type=jnp.float32) + b4_ref[...]
    out_ref[...] = out.astype(out_ref.dtype)


def bert_autoencoder_forward(x, params, *, batch_tile=None,
                             out_dtype=jnp.bfloat16):
    """Autoencoder forward pass as a single Pallas TPU kernel.

    x: (B, input_dim) float32.
    params: dict with w1..w4 in (in_features, out_features) layout and b1..b4
            (biases, shape (out,) or (1, out)), all float32.
    Returns (B, input_dim) in out_dtype (bf16 by default; pass jnp.float32 for
    the module-exact dtype at the cost of 2x output HBM traffic).
    """
    B, D = x.shape
    H = params["w1"].shape[1]
    L = params["w2"].shape[1]

    n_cores, vmem_cap = _tpu_generation_info()
    if batch_tile is None:
        batch_tile = _pick_batch_tile(B, n_cores)
    batch_tile = max(8, int(batch_tile))
    grid = (pl.cdiv(B, batch_tile),)   # partial last block handled by Pallas

    # Biases as (1, out) for 2-D TPU-friendly broadcast (reshape is free).
    b1 = jnp.reshape(params["b1"], (1, H))
    b2 = jnp.reshape(params["b2"], (1, L))
    b3 = jnp.reshape(params["b3"], (1, H))
    b4 = jnp.reshape(params["b4"], (1, D))

    def batch_map(i):
        return (i, 0)

    def rep_map(i):
        return (0, 0)   # weights/biases resident in VMEM across all grid steps

    # --- VMEM budget / cost estimate ---------------------------------------
    out_itm = jnp.dtype(out_dtype).itemsize
    w_elems = D * H + H * L + L * H + H * D
    b_elems = 2 * H + L + D
    per_row = (2 * D * 4                 # x tile, double-buffered, f32
               + 2 * D * out_itm         # out tile, double-buffered
               + (D + 2 * H + L) * 2     # bf16 copies of x/h/z/d
               + (2 * H + L + D) * 4)    # f32 h/z/d/out intermediates
    weight_bytes = 2 * 4 * (w_elems + b_elems)   # f32, conservatively x2 buffers
    vmem_est = weight_bytes + batch_tile * per_row + (2 << 20)
    vmem_limit = int(min(max(vmem_est, 32 << 20), vmem_cap))

    flops = 2 * B * w_elems
    bytes_accessed = B * D * (4 + out_itm) + 4 * (w_elems + b_elems)
    cost = pl.CostEstimate(flops=flops, transcendentals=0,
                           bytes_accessed=bytes_accessed)

    out = pl.pallas_call(
        _ae_kernel,
        out_shape=jax.ShapeDtypeStruct((B, D), out_dtype),
        grid_spec=pltpu.PrefetchScalarGridSpec(
            num_scalar_prefetch=0,
            grid=grid,
            in_specs=[
                pl.BlockSpec((batch_tile, D), batch_map),   # x tile (f32)
                pl.BlockSpec((D, H), rep_map),              # w1 (full, resident)
                pl.BlockSpec((1, H), rep_map),              # b1
                pl.BlockSpec((H, L), rep_map),              # w2
                pl.BlockSpec((1, L), rep_map),              # b2
                pl.BlockSpec((L, H), rep_map),              # w3
                pl.BlockSpec((1, H), rep_map),              # b3
                pl.BlockSpec((H, D), rep_map),              # w4
                pl.BlockSpec((1, D), rep_map),              # b4
            ],
            out_specs=pl.BlockSpec((batch_tile, D), batch_map),
        ),
        compiler_params=pltpu.CompilerParams(
            dimension_semantics=("parallel",),
            vmem_limit_bytes=vmem_limit),
        cost_estimate=cost,
    )(x, params["w1"], b1, params["w2"], b2, params["w3"], b3, params["w4"], b4)

    return out


def init_params(key, input_dim, hidden_dim=128, latent_dim=64):
    """nn.Linear-style init U(-1/sqrt(fan_in), +1/sqrt(fan_in)).

    Weights are returned already transposed to (in_features, out_features);
    biases shaped (1, out_features)."""
    dims = [
        ("w1", "b1", input_dim, hidden_dim),
        ("w2", "b2", hidden_dim, latent_dim),
        ("w3", "b3", latent_dim, hidden_dim),
        ("w4", "b4", hidden_dim, input_dim),
    ]
    params = {}
    keys = jax.random.split(key, 2 * len(dims))
    for i, (wn, bn, fan_in, fan_out) in enumerate(dims):
        bound = 1.0 / jnp.sqrt(jnp.float32(fan_in))
        params[wn] = jax.random.uniform(
            keys[2 * i], (fan_in, fan_out), jnp.float32, -bound, bound)
        params[bn] = jax.random.uniform(
            keys[2 * i + 1], (1, fan_out), jnp.float32, -bound, bound)
    return params


def reference_forward(x, p, compute_dtype=jnp.float32):
    """Plain-JAX reference (eval-mode: dropout = identity)."""
    cd = compute_dtype

    def lin(a, w, b):
        return jnp.dot(a.astype(cd), w.astype(cd),
                       preferred_element_type=jnp.float32) + b

    h = jnp.maximum(lin(x, p["w1"], p["b1"]), 0.0)
    z = jnp.maximum(lin(h, p["w2"], p["b2"]), 0.0)
    d = jnp.maximum(lin(z, p["w3"], p["b3"]), 0.0)
    return lin(d, p["w4"], p["b4"])


if __name__ == "__main__":
    key = jax.random.PRNGKey(0)
    k_x, k_p, k_x2 = jax.random.split(key, 3)

    # Small shapes consistent with the module: embedding-like rows, tiny batch.
    batch, input_dim, hidden_dim, latent_dim = 8, 32, 128, 64
    params = init_params(k_p, input_dim, hidden_dim, latent_dim)

    # --- case 1: aligned batch, single tile, bf16 output --------------------
    x = jax.random.normal(k_x, (batch, input_dim), dtype=jnp.float32)
    out = jax.block_until_ready(bert_autoencoder_forward(x, params))
    assert out.shape == (batch, input_dim)
    assert out.dtype == jnp.bfloat16
    ref_bf = reference_forward(x, params, compute_dtype=jnp.bfloat16)
    assert jnp.allclose(out.astype(jnp.float32), ref_bf, atol=2e-2, rtol=2e-2), \
        "mismatch vs bf16-operand reference"
    ref32 = reference_forward(x, params, compute_dtype=jnp.float32)
    assert jnp.allclose(out.astype(jnp.float32), ref32, atol=1e-1, rtol=1e-1), \
        "mismatch vs f32 reference"

    # --- case 2: ragged batch, grid > 1, partial last block (no wrapper pad) -
    batch2 = 20
    x2 = jax.random.normal(k_x2, (batch2, input_dim), dtype=jnp.float32)
    out2 = jax.block_until_ready(
        bert_autoencoder_forward(x2, params, batch_tile=16))   # grid = cdiv(20,16) = 2
    assert out2.shape == (batch2, input_dim)
    ref2 = reference_forward(x2, params, compute_dtype=jnp.bfloat16)
    assert jnp.allclose(out2.astype(jnp.float32), ref2, atol=2e-2, rtol=2e-2), \
        "ragged/partial-block mismatch"

    # --- case 3: module-exact f32 output path --------------------------------
    out3 = jax.block_until_ready(
        bert_autoencoder_forward(x, params, out_dtype=jnp.float32))
    assert out3.dtype == jnp.float32
    assert jnp.allclose(out3, ref_bf, atol=2e-2, rtol=2e-2), "f32-output mismatch"

    print("KERNEL_OK")
</pallas_src>

<mosaic_0001>
module attributes {stable_mosaic.version = 11 : i64} {
  func.func @_ae_kernel(%arg0: i32, %arg1: memref<8x32xf32, #tpu.memory_space<vmem>>, %arg2: memref<32x128xf32, #tpu.memory_space<vmem>>, %arg3: memref<1x128xf32, #tpu.memory_space<vmem>>, %arg4: memref<128x64xf32, #tpu.memory_space<vmem>>, %arg5: memref<1x64xf32, #tpu.memory_space<vmem>>, %arg6: memref<64x128xf32, #tpu.memory_space<vmem>>, %arg7: memref<1x128xf32, #tpu.memory_space<vmem>>, %arg8: memref<128x32xf32, #tpu.memory_space<vmem>>, %arg9: memref<1x32xf32, #tpu.memory_space<vmem>>, %arg10: memref<8x32xbf16, #tpu.memory_space<vmem>>) attributes {dimension_semantics = [#tpu.dimension_semantics<parallel>], iteration_bounds = array<i64: 1>, scalar_prefetch = 0 : i64, scratch_operands = 0 : i64, tpu.core_type = #tpu.core_type<tc>, window_params = [{transform_indices = @transform_0, window_bounds = array<i64: 8, 32>}, {pipeline_mode = #tpu.pipeline_mode<synchronous>, transform_indices = @transform_1, window_bounds = array<i64: 32, 128>}, {pipeline_mode = #tpu.pipeline_mode<synchronous>, transform_indices = @transform_2, window_bounds = array<i64: 1, 128>}, {pipeline_mode = #tpu.pipeline_mode<synchronous>, transform_indices = @transform_3, window_bounds = array<i64: 128, 64>}, {pipeline_mode = #tpu.pipeline_mode<synchronous>, transform_indices = @transform_4, window_bounds = array<i64: 1, 64>}, {pipeline_mode = #tpu.pipeline_mode<synchronous>, transform_indices = @transform_5, window_bounds = array<i64: 64, 128>}, {pipeline_mode = #tpu.pipeline_mode<synchronous>, transform_indices = @transform_6, window_bounds = array<i64: 1, 128>}, {pipeline_mode = #tpu.pipeline_mode<synchronous>, transform_indices = @transform_7, window_bounds = array<i64: 128, 32>}, {pipeline_mode = #tpu.pipeline_mode<synchronous>, transform_indices = @transform_8, window_bounds = array<i64: 1, 32>}, {transform_indices = @transform_9, window_bounds = array<i64: 8, 32>}]} {
    %c0 = arith.constant 0 : index
    %c0_0 = arith.constant 0 : index
    %0 = vector.load %arg1[%c0, %c0_0] : memref<8x32xf32, #tpu.memory_space<vmem>>, vector<8x32xf32>
    %1 = arith.truncf %0 : vector<8x32xf32> to vector<8x32xbf16>
    %c0_1 = arith.constant 0 : index
    %c0_2 = arith.constant 0 : index
    %2 = vector.load %arg2[%c0_1, %c0_2] : memref<32x128xf32, #tpu.memory_space<vmem>>, vector<32x128xf32>
    %3 = arith.truncf %2 : vector<32x128xf32> to vector<32x128xbf16>
    %cst = arith.constant dense<0.000000e+00> : vector<8x128xf32>
    %4 = tpu.matmul %1, %3, %cst {dimension_numbers = #tpu.dot_dimension_numbers<[1], [0], [0], [1], [0, 0, 1, 1], [], []>} : vector<8x32xbf16>, vector<32x128xbf16>, vector<8x128xf32> -> vector<8x128xf32>
    %c0_3 = arith.constant 0 : index
    %c0_4 = arith.constant 0 : index
    %5 = vector.load %arg3[%c0_3, %c0_4] : memref<1x128xf32, #tpu.memory_space<vmem>>, vector<1x128xf32>
    %6 = vector.broadcast %5 : vector<1x128xf32> to vector<8x128xf32>
    %7 = arith.addf %4, %6 : vector<8x128xf32>
    %cst_5 = arith.constant 0.000000e+00 : f32
    %8 = vector.broadcast %cst_5 : f32 to vector<8x128xf32>
    %9 = arith.maximumf %7, %8 : vector<8x128xf32>
    %10 = arith.truncf %9 : vector<8x128xf32> to vector<8x128xbf16>
    %c0_6 = arith.constant 0 : index
    %c0_7 = arith.constant 0 : index
    %11 = vector.load %arg4[%c0_6, %c0_7] : memref<128x64xf32, #tpu.memory_space<vmem>>, vector<128x64xf32>
    %12 = arith.truncf %11 : vector<128x64xf32> to vector<128x64xbf16>
    %cst_8 = arith.constant dense<0.000000e+00> : vector<8x64xf32>
    %13 = tpu.matmul %10, %12, %cst_8 {dimension_numbers = #tpu.dot_dimension_numbers<[1], [0], [0], [1], [0, 0, 1, 1], [], []>} : vector<8x128xbf16>, vector<128x64xbf16>, vector<8x64xf32> -> vector<8x64xf32>
    %c0_9 = arith.constant 0 : index
    %c0_10 = arith.constant 0 : index
    %14 = vector.load %arg5[%c0_9, %c0_10] : memref<1x64xf32, #tpu.memory_space<vmem>>, vector<1x64xf32>
    %15 = vector.broadcast %14 : vector<1x64xf32> to vector<8x64xf32>
    %16 = arith.addf %13, %15 : vector<8x64xf32>
    %cst_11 = arith.constant 0.000000e+00 : f32
    %17 = vector.broadcast %cst_11 : f32 to vector<8x64xf32>
    %18 = arith.maximumf %16, %17 : vector<8x64xf32>
    %19 = arith.truncf %18 : vector<8x64xf32> to vector<8x64xbf16>
    %c0_12 = arith.constant 0 : index
    %c0_13 = arith.constant 0 : index
    %20 = vector.load %arg6[%c0_12, %c0_13] : memref<64x128xf32, #tpu.memory_space<vmem>>, vector<64x128xf32>
    %21 = arith.truncf %20 : vector<64x128xf32> to vector<64x128xbf16>
    %cst_14 = arith.constant dense<0.000000e+00> : vector<8x128xf32>
    %22 = tpu.matmul %19, %21, %cst_14 {dimension_numbers = #tpu.dot_dimension_numbers<[1], [0], [0], [1], [0, 0, 1, 1], [], []>} : vector<8x64xbf16>, vector<64x128xbf16>, vector<8x128xf32> -> vector<8x128xf32>
    %c0_15 = arith.constant 0 : index
    %c0_16 = arith.constant 0 : index
    %23 = vector.load %arg7[%c0_15, %c0_16] : memref<1x128xf32, #tpu.memory_space<vmem>>, vector<1x128xf32>
    %24 = vector.broadcast %23 : vector<1x128xf32> to vector<8x128xf32>
    %25 = arith.addf %22, %24 : vector<8x128xf32>
    %cst_17 = arith.constant 0.000000e+00 : f32
    %26 = vector.broadcast %cst_17 : f32 to vector<8x128xf32>
    %27 = arith.maximumf %25, %26 : vector<8x128xf32>
    %28 = arith.truncf %27 : vector<8x128xf32> to vector<8x128xbf16>
    %c0_18 = arith.constant 0 : index
    %c0_19 = arith.constant 0 : index
    %29 = vector.load %arg8[%c0_18, %c0_19] : memref<128x32xf32, #tpu.memory_space<vmem>>, vector<128x32xf32>
    %30 = arith.truncf %29 : vector<128x32xf32> to vector<128x32xbf16>
    %cst_20 = arith.constant dense<0.000000e+00> : vector<8x32xf32>
    %31 = tpu.matmul %28, %30, %cst_20 {dimension_numbers = #tpu.dot_dimension_numbers<[1], [0], [0], [1], [0, 0, 1, 1], [], []>} : vector<8x128xbf16>, vector<128x32xbf16>, vector<8x32xf32> -> vector<8x32xf32>
    %c0_21 = arith.constant 0 : index
    %c0_22 = arith.constant 0 : index
    %32 = vector.load %arg9[%c0_21, %c0_22] : memref<1x32xf32, #tpu.memory_space<vmem>>, vector<1x32xf32>
    %33 = vector.broadcast %32 : vector<1x32xf32> to vector<8x32xf32>
    %34 = arith.addf %31, %33 : vector<8x32xf32>
    %35 = arith.truncf %34 : vector<8x32xf32> to vector<8x32xbf16>
    %c0_23 = arith.constant 0 : index
    %c0_24 = arith.constant 0 : index
    %36 = vector.load %arg10[%c0_23, %c0_24] : memref<8x32xbf16, #tpu.memory_space<vmem>>, vector<8x32xbf16>
    tpu.vector_store %arg10[%c0_23, %c0_24], %35 {strides = array<i32>} : memref<8x32xbf16, #tpu.memory_space<vmem>>, vector<8x32xbf16>,
    return
  }
  func.func @transform_0(%arg0: i32) -> (i32, i32) {
    %c0_i32 = arith.constant 0 : i32
    %c0_i32_0 = arith.constant 0 : i32
    return %arg0, %c0_i32 : i32, i32
  }
  func.func @transform_1(%arg0: i32) -> (i32, i32) {
    %c0_i32 = arith.constant 0 : i32
    %c0_i32_0 = arith.constant 0 : i32
    %c0_i32_1 = arith.constant 0 : i32
    return %c0_i32, %c0_i32_0 : i32, i32
  }
  func.func @transform_2(%arg0: i32) -> (i32, i32) {
    %c0_i32 = arith.constant 0 : i32
    %c0_i32_0 = arith.constant 0 : i32
    %c0_i32_1 = arith.constant 0 : i32
    return %c0_i32, %c0_i32_0 : i32, i32
  }
  func.func @transform_3(%arg0: i32) -> (i32, i32) {
    %c0_i32 = arith.constant 0 : i32
    %c0_i32_0 = arith.constant 0 : i32
    %c0_i32_1 = arith.constant 0 : i32
    return %c0_i32, %c0_i32_0 : i32, i32
  }
  func.func @transform_4(%arg0: i32) -> (i32, i32) {
    %c0_i32 = arith.constant 0 : i32
    %c0_i32_0 = arith.constant 0 : i32
    %c0_i32_1 = arith.constant 0 : i32
    return %c0_i32, %c0_i32_0 : i32, i32
  }
  func.func @transform_5(%arg0: i32) -> (i32, i32) {
    %c0_i32 = arith.constant 0 : i32
    %c0_i32_0 = arith.constant 0 : i32
    %c0_i32_1 = arith.constant 0 : i32
    return %c0_i32, %c0_i32_0 : i32, i32
  }
  func.func @transform_6(%arg0: i32) -> (i32, i32) {
    %c0_i32 = arith.constant 0 : i32
    %c0_i32_0 = arith.constant 0 : i32
    %c0_i32_1 = arith.constant 0 : i32
    return %c0_i32, %c0_i32_0 : i32, i32
  }
  func.func @transform_7(%arg0: i32) -> (i32, i32) {
    %c0_i32 = arith.constant 0 : i32
    %c0_i32_0 = arith.constant 0 : i32
    %c0_i32_1 = arith.constant 0 : i32
    return %c0_i32, %c0_i32_0 : i32, i32
  }
  func.func @transform_8(%arg0: i32) -> (i32, i32) {
    %c0_i32 = arith.constant 0 : i32
    %c0_i32_0 = arith.constant 0 : i32
    %c0_i32_1 = arith.constant 0 : i32
    return %c0_i32, %c0_i32_0 : i32, i32
  }
  func.func @transform_9(%arg0: i32) -> (i32, i32) {
    %c0_i32 = arith.constant 0 : i32
    %c0_i32_0 = arith.constant 0 : i32
    return %arg0, %c0_i32 : i32, i32
  }
}

</mosaic_0001>

<bundles_post_ra>
// kernel: tpu_custom_call.1
= control target key start
LH: loop header
LB: loop body
LE: loop exit
PB: predicated region body
PF: predicated region fallthrough
CT: control target
= control target key end

     0   :  { %v440_v3 = vmov 0.0   ;;  %vm441_vm0 = vmmov 0   ;;  %s682_s0 = inlined_call_operand.vmem [shape: f32[8,32], index: 0, kind: input, shape index: {}]   ;;  %s683_s1 = inlined_call_operand.vmem [shape: f32[32,128], index: 1, kind: input, shape index: {}]   ;;  %s684_s2 = inlined_call_operand.vmem [shape: f32[1,128], index: 2, kind: input, shape index: {}]   ;;  %s685_s3 = inlined_call_operand.vmem [shape: f32[128,64], index: 3, kind: input, shape index: {}]   ;;  %s686_s4 = inlined_call_operand.vmem [shape: f32[1,64], index: 4, kind: input, shape index: {}]   ;;  %s687_s5 = inlined_call_operand.vmem [shape: f32[64,128], index: 5, kind: input, shape index: {}]   ;;  %s688_s6 = inlined_call_operand.vmem [shape: f32[1,128], index: 6, kind: input, shape index: {}]   ;;  %s689_s7 = inlined_call_operand.vmem [shape: f32[128,32], index: 7, kind: input, shape index: {}]   ;;  %s690_s8 = inlined_call_operand.vmem [shape: f32[1,32], index: 8, kind: input, shape index: {}]   ;;  %s691_s9 = inlined_call_operand.hbm [shape: bf16[8,32], index: 9, kind: output, shape index: {}]  }
   0x1   :  { %v36_v0 = vld [vmem:[%s683_s1] sm:$0xff]  ;;  %v37_v1 = vld [vmem:[%s683_s1 + $0x8] sm:$0xff]  ;;  %v38_v2 = vld [vmem:[%s683_s1 + $0x10] sm:$0xff]  ;;  %353 = vmatprep.subr.bf16.mxu1 %v440_v3  ;;  %357 = vmatprep.mubr.msk.bf16.mxu1 %vm441_vm0, %v440_v3 }
   0x2   :  { %v40_v4 = vpack.c.bf16 %v37_v1, %v36_v0  ;;  %v39_v5 = vld [vmem:[%s683_s1 + $0x18] sm:$0xff]  ;;  %381 = vmatprep.subr.bf16.mxu0 %v440_v3  ;;  %389 = vmatprep.mubr.msk.bf16.mxu0 %vm441_vm0, %v440_v3  ;;  %v34_v7 = vld [vmem:[%s682_s0] sm:$0xff]  ;;  %v96_v9 = vld [vmem:[%s685_s3 + $0x8] sm:$0xff] }
   0x3   :  { %v41_v6 = vpack.c.bf16 %v39_v5, %v38_v2  ;;  %v95_v8 = vld [vmem:[%s685_s3] sm:$0xff]  ;;  %v35_v10 = vpack.c.bf16 %v34_v7, %v34_v7 }
   0x4   :  { %354 = vmatpush3.bf16.msra.mxu1 %v40_v4 }
   0x5   :  { %355 = vmatprep.subr.bf16.mxu1 %v440_v3 }
   0x6   :  { %14 = vsyncpa [#allocation3], 0  ;;  %vm49_vm1 = vcmask 261120   ;;  %v111_v11 = vpack.c.bf16 %v96_v9, %v95_v8  ;;  %v97_v12 = vld [vmem:[%s685_s3 + $0x10] sm:$0xff]  ;;  %v98_v13 = vld [vmem:[%s685_s3 + $0x18] sm:$0xff]  ;;  %vm187_vm2 = vcmask 523264  }
   0x7   :  { %v112_v14 = vpack.c.bf16 %v98_v13, %v97_v12  ;;  %v99_v15 = vld [vmem:[%s685_s3 + $0x20] sm:$0xff]  ;;  %v100_v16 = vld [vmem:[%s685_s3 + $0x28] sm:$0xff]  ;;  %v101_v18 = vld [vmem:[%s685_s3 + $0x30] sm:$0xff]  ;;  %vm305_vm3 = vcmask 257024  }
   0x8   :  { %356 = vmatpush3.bf16.msra.mxu1 %v41_v6  ;;  %v113_v17 = vpack.c.bf16 %v100_v16, %v99_v15  ;;  %v102_v19 = vld [vmem:[%s685_s3 + $0x38] sm:$0xff]  ;;  %v103_v21 = vld [vmem:[%s685_s3 + $0x40] sm:$0xff]  ;;  %v104_v22 = vld [vmem:[%s685_s3 + $0x48] sm:$0xff] }
   0x9   :  { %361 = vmatprep.subr.bf16.mxu1 %v440_v3  ;;  %v114_v20 = vpack.c.bf16 %v102_v19, %v101_v18  ;;  %v115_v23 = vpack.c.bf16 %v104_v22, %v103_v21  ;;  %v105_v24 = vld [vmem:[%s685_s3 + $0x50] sm:$0xff]  ;;  %v106_v25 = vld [vmem:[%s685_s3 + $0x58] sm:$0xff]  ;;  %v107_v27 = vld [vmem:[%s685_s3 + $0x60] sm:$0xff] }
   0xa   :  { %v116_v26 = vpack.c.bf16 %v106_v25, %v105_v24  ;;  %v108_v28 = vld [vmem:[%s685_s3 + $0x68] sm:$0xff]  ;;  %v109_v30 = vld [vmem:[%s685_s3 + $0x70] sm:$0xff]  ;;  %v110_v31 = vld [vmem:[%s685_s3 + $0x78] sm:$0xff] }
   0xb   :  { %358 = vmatmul.mubr.msk.bf16.vlgmr.msra.gmra.mrb[0].mxu1 %vm49_vm1, %v35_v10  ;;  %v117_v29 = vpack.c.bf16 %v108_v28, %v107_v27  ;;  %v118_v32 = vpack.c.bf16 %v110_v31, %v109_v30  ;;  %v168_v33 = vld [vmem:[%s687_s5] sm:$0xff]  ;;  %v169_v34 = vld [vmem:[%s687_s5 + $0x8] sm:$0xff]  ;;  %v170_v35 = vld [vmem:[%s687_s5 + $0x10] sm:$0xff] }
   0xc   :  { %362 = vmatpush3.bf16.msra.mxu1 %v111_v11  ;;  %377 = vmatprep.mubr.msk.bf16.mxu1 %vm441_vm0, %v440_v3  ;;  %v176_v36 = vpack.c.bf16 %v169_v34, %v168_v33  ;;  %v171_v37 = vld [vmem:[%s687_s5 + $0x18] sm:$0xff]  ;;  %v321_v39 = vld [vmem:[%s684_s2] ss:$0 sm:$0xff]  ;;  %v173_v48 = vld [vmem:[%s687_s5 + $0x28] sm:$0xff] }
   0xd   :  { %363 = vmatprep.subr.bf16.mxu1 %v440_v3  ;;  %v177_v38 = vpack.c.bf16 %v171_v37, %v170_v35  ;;  %v172_v47 = vld [vmem:[%s687_s5 + $0x20] sm:$0xff]  ;;  %v174_v50 = vld [vmem:[%s687_s5 + $0x30] sm:$0xff]  ;;  %v175_v51 = vld [vmem:[%s687_s5 + $0x38] sm:$0xff] }
   0xe   :  { %382 = vmatpush3.bf16.msra.mxu0 %v176_v36  ;;  %v178_v49 = vpack.c.bf16 %v173_v48, %v172_v47  ;;  %v179_v52 = vpack.c.bf16 %v175_v51, %v174_v50  ;;  %v323_v53 = vld [vmem:[%s686_s4] ss:$0 sm:$0xff]  ;;  %v234_v58 = vld [vmem:[%s689_s7 + $0x8] sm:$0xff]  ;;  %v235_v0 = vld [vmem:[%s689_s7 + $0x10] sm:$0xff] }
   0xf   :  { %383 = vmatprep.subr.bf16.mxu0 %v440_v3  ;;  %v233_v57 = vld [vmem:[%s689_s7] sm:$0xff]  ;;  %v236_v1 = vld [vmem:[%s689_s7 + $0x18] sm:$0xff]  ;;  %v238_v5 = vld [vmem:[%s689_s7 + $0x28] sm:$0xff] }
  0x10   :  { %364 = vmatpush3.bf16.msra.mxu1 %v112_v14  ;;  %v249_v62 = vpack.c.bf16 %v234_v58, %v233_v57  ;;  %v250_v2 = vpack.c.bf16 %v236_v1, %v235_v0  ;;  %v237_v4 = vld [vmem:[%s689_s7 + $0x20] sm:$0xff]  ;;  %v239_v7 = vld [vmem:[%s689_s7 + $0x30] sm:$0xff]  ;;  %v240_v8 = vld [vmem:[%s689_s7 + $0x38] sm:$0xff] }
  0x11   :  { %365 = vmatprep.subr.bf16.mxu1 %v440_v3  ;;  %v251_v6 = vpack.c.bf16 %v238_v5, %v237_v4  ;;  %v252_v9 = vpack.c.bf16 %v240_v8, %v239_v7  ;;  %v241_v10 = vld [vmem:[%s689_s7 + $0x40] sm:$0xff]  ;;  %v242_v11 = vld [vmem:[%s689_s7 + $0x48] sm:$0xff]  ;;  %v243_v13 = vld [vmem:[%s689_s7 + $0x50] sm:$0xff] }
  0x12   :  { %384 = vmatpush3.bf16.msra.mxu0 %v177_v38  ;;  %v253_v12 = vpack.c.bf16 %v242_v11, %v241_v10  ;;  %v244_v14 = vld [vmem:[%s689_s7 + $0x58] sm:$0xff]  ;;  %v245_v16 = vld [vmem:[%s689_s7 + $0x60] sm:$0xff]  ;;  %v247_v19 = vld [vmem:[%s689_s7 + $0x70] sm:$0xff] }
  0x13   :  { %385 = vmatprep.subr.bf16.mxu0 %v440_v3  ;;  %v254_v15 = vpack.c.bf16 %v244_v14, %v243_v13  ;;  %v324_v22 = vld [vmem:[%s688_s6] ss:$0 sm:$0xff] }
  0x14   :  { %366 = vmatpush3.bf16.msra.mxu1 %v113_v17  ;;  %v246_v17 = vld [vmem:[%s689_s7 + $0x68] sm:$0xff] }
  0x15   :  { %367 = vmatprep.subr.bf16.mxu1 %v440_v3  ;;  %v255_v18 = vpack.c.bf16 %v246_v17, %v245_v16 }
  0x16   :  { %386 = vmatpush3.bf16.msra.mxu0 %v178_v49 }
  0x17   :  { %387 = vmatprep.subr.bf16.mxu0 %v440_v3 }
  0x18   :  { %368 = vmatpush3.bf16.msra.mxu1 %v114_v20  ;;  %v248_v20 = vld [vmem:[%s689_s7 + $0x78] sm:$0xff]  ;;  %s442_s7 = smov [#allocation2]  }
  0x19   :  { %369 = vmatprep.subr.bf16.mxu1 %v440_v3  ;;  %v256_v21 = vpack.c.bf16 %v248_v20, %v247_v19  ;;  %s313_s28 = sshll.u32 %s442_s7, 4  ;;  %s314_s28 = int_to_ptr.vmem [resolvable:$true] %s313_s28 }
  0x1a   :  { %388 = vmatpush3.bf16.msra.mxu0 %v179_v52  ;;  %s416_s6 = scalar_lea.vmem %s314_s28, 64  ;;  %p421_p1 = scmp.lt.s32.totalorder %s314_s28, %s314_s28 }
  0x1b   :  { %393 = vmatprep.subr.bf16.mxu0 %v440_v3  ;;  %p417_p0 = scmp.ne.s32.totalorder %s314_s28, %s416_s6  ;;  %p422_p2 = scmp.lt.s32.totalorder %s416_s6, %s416_s6 }
  0x1c   :  { %370 = vmatpush3.bf16.msra.mxu1 %v115_v23 }
  0x1d   :  { %371 = vmatprep.subr.bf16.mxu1 %v440_v3  ;;  %p423_p3 = por %p422_p2, %p421_p1 }
  0x1f   :  { %p424_p4 = pnand %p423_p3, %p417_p0 }
  0x20   :  { %372 = vmatpush3.bf16.msra.mxu1 %v116_v26 }
  0x21   :  { %373 = vmatprep.subr.bf16.mxu1 %v440_v3 }
  0x24   :  { %374 = vmatpush3.bf16.msra.mxu1 %v117_v29  ;;  %v326_v29 = vld [vmem:[%s690_s8] ss:$0 sm:$0xff] }
  0x25   :  { %375 = vmatprep.subr.bf16.mxu1 %v440_v3 }
  0x28   :  { %376 = vmatpush3.bf16.msra.mxu1 %v118_v32 }
  0xde   :  { %v87_v40 = vpop.f32.mrb[0].mxu1 }
  0xdf   :  { %v88_v41 = vadd.f32 %v321_v39, %v87_v40  ;;  %v359_v42 = vpop.f32.mrb[1].mxu1 }
  0xe0   :  { %v90_v43 = vpop.f32.mrb[2].mxu1 }
  0xe1   :  { %v93_v44 = vmax.f32 %v88_v41, 0.0  ;;  %v360_v45 = vpop.f32.mrb[3].mxu1 }
  0xe3   :  { %v94_v46 = vpack.c.bf16 %v93_v44, %v93_v44 }
  0xe5   :  { %378 = vmatmul.mubr.bf16.vlgmr.msra.gmra.mrb[4].mxu1 %v94_v46 }
 0x1b8   :  { %v160_v54 = vpop.f32.mrb[4].mxu1 }
 0x1b9   :  { %v161_v55 = vadd.f32 %v323_v53, %v160_v54  ;;  %v379_v56 = vpop.f32.mrb[5].mxu1 }
 0x1ba   :  { %v163_v59 = vpop.f32.mrb[6].mxu1 }
 0x1bb   :  { %v166_v60 = vmax.f32 %v161_v55, 0.0  ;;  %v380_v61 = vpop.f32.mrb[7].mxu1 }
 0x1bd   :  { %v167_v63 = vpack.c.bf16 %v166_v60, %v166_v60 }
 0x1bf   :  { %390 = vmatmul.mubr.msk.bf16.vlgmr.msra.gmra.mrb[0].mxu0 %vm187_vm2, %v167_v63 }
 0x1c0   :  { %394 = vmatpush3.bf16.msra.mxu0 %v249_v62  ;;  %409 = vmatprep.mubr.msk.bf16.mxu0 %vm441_vm0, %v440_v3 }
 0x1c1   :  { %395 = vmatprep.subr.bf16.mxu0 %v440_v3 }
 0x1c4   :  { %396 = vmatpush3.bf16.msra.mxu0 %v250_v2 }
 0x1c5   :  { %397 = vmatprep.subr.bf16.mxu0 %v440_v3 }
 0x1c8   :  { %398 = vmatpush3.bf16.msra.mxu0 %v251_v6 }
 0x1c9   :  { %399 = vmatprep.subr.bf16.mxu0 %v440_v3 }
 0x1cc   :  { %400 = vmatpush3.bf16.msra.mxu0 %v252_v9 }
 0x1cd   :  { %401 = vmatprep.subr.bf16.mxu0 %v440_v3 }
 0x1d0   :  { %402 = vmatpush3.bf16.msra.mxu0 %v253_v12 }
 0x1d1   :  { %403 = vmatprep.subr.bf16.mxu0 %v440_v3 }
 0x1d4   :  { %404 = vmatpush3.bf16.msra.mxu0 %v254_v15 }
 0x1d5   :  { %405 = vmatprep.subr.bf16.mxu0 %v440_v3 }
 0x1d8   :  { %406 = vmatpush3.bf16.msra.mxu0 %v255_v18 }
 0x1d9   :  { %407 = vmatprep.subr.bf16.mxu0 %v440_v3 }
 0x1dc   :  { %408 = vmatpush3.bf16.msra.mxu0 %v256_v21 }
 0x292   :  { %v225_v23 = vpop.f32.mrb[0].mxu0 }
 0x293   :  { %v226_v24 = vadd.f32 %v324_v22, %v225_v23  ;;  %v391_v25 = vpop.f32.mrb[1].mxu0 }
 0x294   :  { %v228_v26 = vpop.f32.mrb[2].mxu0 }
 0x295   :  { %v231_v27 = vmax.f32 %v226_v24, 0.0  ;;  %v392_v3 = vpop.f32.mrb[3].mxu0 }
 0x297   :  { %v232_v28 = vpack.c.bf16 %v231_v27, %v231_v27 }
 0x299   :  { %410 = vmatmul.mubr.bf16.vlgmr.msra.gmra.mrb[4].mxu0 %v232_v28 }
 0x36c   :  { %v298_v30 = vpop.f32.mrb[4].mxu0 }
 0x36d   :  { %v299_v31 = vadd.f32 %v326_v29, %v298_v30  ;;  %v411_v32 = vpop.f32.mrb[5].mxu0 }
 0x36e   :  { %v301_v33 = vpop.f32.mrb[6].mxu0 }
 0x36f   :  { %v304_v34 = vpack.c.bf16 %v299_v31, %v299_v31  ;;  %v412_v35 = vpop.f32.mrb[7].mxu0 }
 0x371   :  { %306 = vst.msk [vmem:[#allocation2] sm:$0xf] %vm305_vm3, %v304_v34 }
 0x372   :  { %427 = shalt.err (!%p424_p4)
}
 0x373   :  { %s428_s30 = scalar_lea.hbm %s691_s9, 64 }
 0x374   :  { %p429_p5 = scmp.ne.s32.totalorder %s691_s9, %s428_s30  ;;  %p432_p6 = scmp.lt.u32.totalorder %s428_s30, %s691_s9 }
 0x376   :  { %p434_p7 = pnand %p432_p6, %p429_p5 }
 0x378   :  { %437 = shalt.err (!%p434_p7)
}
 0x379   :  { %316 = dma.vmem_to_hbm [thread:$0]  %s314_s28, 64, %s691_s9, [#allocation3]  }
 0x37a   :  { %438 = dma.done.wait [#allocation3], 64  }
 0x37b   :  { %439 = vsyncadd [#allocation3], 4294967232 }
 0x37c   :  { %320 = vsyncpa [#allocation3], 1 }

</bundles_post_ra>
